<compile_context>
chip_gen: v6e
topology: v6e:2x2x1
jax: 0.10.0
libtpu: 0.0.40
codegen_flags: <defaults>
</compile_context>

<pallas_src>
import jax
import jax.numpy as jnp
from jax import lax
from jax.experimental import pallas as pl
from jax.experimental.pallas import tpu as pltpu

LANES = 128
# Combined HBM traffic (input block + fused f32 copy block) per grid step.
TARGET_STEP_BYTES = 8 << 20


def _round_up(n, m):
    return (n + m - 1) // m * m


def _make_minmax_kernel(block_rows, rows, sub, emit_copy, in_dtype):
    """Per grid step: fold a (block_rows, 128) tile to a one-vreg (8, 128)
    partial min and max, written to this step's slot of the partial outputs.
    Optionally also emits the float32 cast of the tile (fused copy)."""
    rem = rows % block_rows          # static; 0 => every block fully in-bounds
    groups = block_rows // sub       # sub = sublanes of one packed vreg
    fold_native = jnp.issubdtype(in_dtype, jnp.floating)

    def _fold_to_8(mn, mx):
        # (sub, LANES) f32 -> (8, LANES) f32 (elementwise, sublane-aligned)
        if sub != 8:
            mn = jnp.min(mn.reshape(sub // 8, 8, LANES), axis=0)
            mx = jnp.max(mx.reshape(sub // 8, 8, LANES), axis=0)
        return mn, mx

    def kernel(x_ref, min_ref, max_ref, *copy_refs):
        if emit_copy:
            # OOB rows of a partial last block are dropped on writeback.
            copy_refs[0][...] = x_ref[...].astype(jnp.float32)

        def unmasked_fold():
            tile = x_ref[...]
            if not fold_native:
                tile = tile.astype(jnp.float32)
            # Packed-vreg-aligned fold: (groups, sub, 128) reduced over the
            # leading axis is a chain of elementwise vreg min/max (VALU only).
            t = tile.reshape(groups, sub, LANES)
            mn = jnp.min(t, axis=0).astype(jnp.float32)
            mx = jnp.max(t, axis=0).astype(jnp.float32)
            mn, mx = _fold_to_8(mn, mx)
            min_ref[...] = mn[None]
            max_ref[...] = mx[None]

        if rem == 0:
            unmasked_fold()
        else:
            i = pl.program_id(0)
            last = pl.num_programs(0) - 1

            @pl.when(i != last)
            def _():
                unmasked_fold()

            @pl.when(i == last)
            def _():
                # Cold path (runs once): masked fold over only the groups that
                # contain valid rows, one packed vreg at a time, so no
                # block-sized masked temporaries live in VMEM.
                n_valid = pl.cdiv(rem, sub)      # static
                sub_iota = lax.broadcasted_iota(jnp.int32, (sub, LANES), 0)

                def body(g, carry):
                    mn, mx = carry
                    start = pl.multiple_of(g * sub, sub)
                    blk = x_ref[pl.ds(start, sub), :].astype(jnp.float32)
                    ok = (g * sub + sub_iota) < rem
                    mn = jnp.minimum(mn, jnp.where(ok, blk, jnp.inf))
                    mx = jnp.maximum(mx, jnp.where(ok, blk, -jnp.inf))
                    return mn, mx

                init = (jnp.full((sub, LANES), jnp.inf, jnp.float32),
                        jnp.full((sub, LANES), -jnp.inf, jnp.float32))
                mn, mx = lax.fori_loop(0, n_valid, body, init)
                mn, mx = _fold_to_8(mn, mx)
                min_ref[...] = mn[None]
                max_ref[...] = mx[None]

    return kernel


def _aminmax_2d(x2d, emit_copy):
    """x2d: (rows, 128) slab in its native dtype.  Returns (gmin, gmax[, x_f32_2d])."""
    rows = x2d.shape[0]
    itemsize = x2d.dtype.itemsize
    sub = {4: 8, 2: 16, 1: 32}.get(itemsize, 8)   # sublanes per packed vreg

    # Byte-budgeted block size: ~TARGET_STEP_BYTES of HBM traffic per step.
    bytes_per_row = LANES * (itemsize + (4 if emit_copy else 0))
    target_rows = max(sub, (TARGET_STEP_BYTES // bytes_per_row) // sub * sub)
    block_rows = min(target_rows, _round_up(rows, sub))
    n_blocks = pl.cdiv(rows, block_rows)

    out_shape = [
        jax.ShapeDtypeStruct((n_blocks, 8, LANES), jnp.float32),  # partial mins
        jax.ShapeDtypeStruct((n_blocks, 8, LANES), jnp.float32),  # partial maxs
    ]
    out_specs = [
        pl.BlockSpec((1, 8, LANES), lambda i: (i, 0, 0)),
        pl.BlockSpec((1, 8, LANES), lambda i: (i, 0, 0)),
    ]
    if emit_copy:
        out_shape.append(jax.ShapeDtypeStruct((rows, LANES), jnp.float32))
        out_specs.append(pl.BlockSpec((block_rows, LANES), lambda i: (i, 0)))

    # Explicit VMEM budget: double-buffered input (+ fused f32 copy) blocks,
    # plus headroom.  Capped well below v7x's 64 MiB physical VMEM; explicit so
    # the larger blocks also pass v5e's 16 MiB default scoped limit.
    in_block_bytes = block_rows * LANES * itemsize
    copy_block_bytes = block_rows * LANES * 4 if emit_copy else 0
    partial_bytes = 2 * 2 * 8 * LANES * 4
    vmem_limit = 2 * (in_block_bytes + copy_block_bytes) + partial_bytes + (4 << 20)
    vmem_limit = int(min(max(vmem_limit, 16 << 20), 48 << 20))

    outs = pl.pallas_call(
        _make_minmax_kernel(block_rows, rows, sub, emit_copy, x2d.dtype),
        out_shape=tuple(out_shape),
        grid_spec=pltpu.PrefetchScalarGridSpec(
            num_scalar_prefetch=0,
            grid=(n_blocks,),
            in_specs=[pl.BlockSpec((block_rows, LANES), lambda i: (i, 0))],
            out_specs=tuple(out_specs),
        ),
        compiler_params=pltpu.CompilerParams(
            # Every step writes its own disjoint partial slot -> fully parallel
            # (shards the grid across both TensorCores on megacore parts).
            dimension_semantics=("parallel",),
            vmem_limit_bytes=vmem_limit,
        ),
    )(x2d)

    gmin = jnp.min(outs[0])
    gmax = jnp.max(outs[1])
    if emit_copy:
        return gmin, gmax, outs[2]
    return gmin, gmax


def _running_avg(min_val, max_val, gmin, gmax, cnt):
    # cnt is the pre-update count (traced f32 scalar) -> no recompile per call.
    new_min = jnp.where(cnt == 0, gmin, (min_val * cnt + gmin) / (cnt + 1.0))
    new_max = jnp.where(cnt == 0, gmax, (max_val * cnt + gmax) / (cnt + 1.0))
    return new_min, new_max


@jax.jit
def _observe_update_f32(x, min_val, max_val, cnt):
    """Global min/max of f32 x (single read pass, no copy) + running-avg update."""
    if x.size % LANES != 0:
        # Rare non-lane-aligned shape: tiny pure-JAX fallback (keeps the common
        # path free of any pad/concat HBM pass).
        gmin, gmax = jnp.min(x), jnp.max(x)
    else:
        gmin, gmax = _aminmax_2d(x.reshape(-1, LANES), emit_copy=False)
    return _running_avg(min_val, max_val, gmin, gmax, cnt)


@jax.jit
def _observe_update_cast(x, min_val, max_val, cnt):
    """Global min/max + fused float32 copy of x (1 read + 1 write) + running avg."""
    if x.size % LANES != 0:
        out = x.astype(jnp.float32)
        gmin, gmax = jnp.min(out), jnp.max(out)
    else:
        gmin, gmax, xf2d = _aminmax_2d(x.reshape(-1, LANES), emit_copy=True)
        out = xf2d.reshape(x.shape)
    new_min, new_max = _running_avg(min_val, max_val, gmin, gmax, cnt)
    return new_min, new_max, out


class AvgMinMaxObserver:
    """JAX/Pallas port of AvgMinMaxObserver: running average of per-batch
    global min/max, for PTQ calibration. ch_axis must be -1 (per-tensor)."""

    def __init__(self, bit=8, symmetric=False, ch_axis=-1):
        assert ch_axis == -1, "AvgMinMaxObserver is per-tensor (ch_axis=-1) only"
        self.bit = bit
        self.symmetric = symmetric
        self.ch_axis = ch_axis
        self.eps = jnp.float32(1e-08)
        if self.symmetric:
            self.quant_min = -2 ** (self.bit - 1)
            self.quant_max = 2 ** (self.bit - 1) - 1
        else:
            self.quant_min = 0
            self.quant_max = 2 ** self.bit - 1
        # buffers (scalar, per-tensor)
        self.min_val = jnp.float32(jnp.inf)
        self.max_val = jnp.float32(-jnp.inf)
        self.cnt = 0

    def __call__(self, x_orig, observation_mask=None, seq_pos=-1):
        if x_orig.size == 0:
            return x_orig
        # TODO(synk): remove_padding (ragged per-sequence gather driven by
        # observation_mask) is host-side data prep in the original; only the
        # dense per-tensor path is implemented here.
        assert observation_mask is None
        assert self.ch_axis == -1

        x = jnp.asarray(x_orig)
        cnt_f = jnp.float32(self.cnt)
        if x.dtype == jnp.float32:
            # JAX arrays are immutable: the "detached clone" is x itself, so we
            # avoid an extra HBM pass and only read x once inside the kernel.
            self.min_val, self.max_val = _observe_update_f32(
                x, self.min_val, self.max_val, cnt_f)
            out = x
        else:
            # Fuse the float32 cast/copy into the same kernel pass.
            self.min_val, self.max_val, out = _observe_update_cast(
                x, self.min_val, self.max_val, cnt_f)
        self.cnt += 1
        return out

    def calculate_qparams(self, min_val, max_val):
        # scalar glue (asymmetric / symmetric per-tensor qparams)
        min_val_neg = jnp.minimum(min_val, 0.0)
        max_val_pos = jnp.maximum(max_val, 0.0)
        if self.symmetric:
            max_val_pos = jnp.maximum(-min_val_neg, max_val_pos)
            scale = max_val_pos / (float(self.quant_max - self.quant_min) / 2)
            scale = jnp.maximum(scale, self.eps)
            zero_point = jnp.int32(0)
        else:
            scale = (max_val_pos - min_val_neg) / float(self.quant_max - self.quant_min)
            scale = jnp.maximum(scale, self.eps)
            zero_point = self.quant_min - jnp.round(min_val_neg / scale)
            zero_point = jnp.clip(zero_point, self.quant_min, self.quant_max)
            zero_point = zero_point.astype(jnp.int32)   # integer zero_point
        return scale, zero_point


if __name__ == "__main__":
    key = jax.random.PRNGKey(0)
    k1, k2, k3, k4 = jax.random.split(key, 4)

    # --- float32 path: running average over two batches (batch=2, seq=16, hidden=64)
    x1 = jax.random.normal(k1, (2, 16, 64), dtype=jnp.float32)
    x2 = jax.random.normal(k2, (2, 16, 64), dtype=jnp.float32) * 3.0 + 1.0

    obs = AvgMinMaxObserver(bit=8, symmetric=False, ch_axis=-1)
    y1 = obs(x1)
    y2 = obs(x2)
    jax.block_until_ready((y1, y2, obs.min_val, obs.max_val))

    ref_min = (jnp.min(x1) + jnp.min(x2)) / 2.0
    ref_max = (jnp.max(x1) + jnp.max(x2)) / 2.0
    assert y1.dtype == jnp.float32 and y1.shape == x1.shape
    assert jnp.allclose(y2, x2)
    assert jnp.allclose(obs.min_val, ref_min, rtol=1e-6, atol=1e-6), (obs.min_val, ref_min)
    assert jnp.allclose(obs.max_val, ref_max, rtol=1e-6, atol=1e-6), (obs.max_val, ref_max)

    # --- bf16 path (fused cast) with a row count that exercises last-block masking
    x3 = (jax.random.normal(k3, (3, 5, 128), dtype=jnp.float32) * 2.0).astype(jnp.bfloat16)
    obs2 = AvgMinMaxObserver(bit=8, symmetric=True, ch_axis=-1)
    y3 = obs2(x3)
    jax.block_until_ready((y3, obs2.min_val, obs2.max_val))

    x3_f32 = x3.astype(jnp.float32)
    assert y3.dtype == jnp.float32 and y3.shape == x3.shape
    assert jnp.allclose(y3, x3_f32)
    assert jnp.allclose(obs2.min_val, jnp.min(x3_f32)), (obs2.min_val, jnp.min(x3_f32))
    assert jnp.allclose(obs2.max_val, jnp.max(x3_f32)), (obs2.max_val, jnp.max(x3_f32))

    # --- f32 path with rows % block_rows != 0 (masked last-block regression test)
    x4 = jax.random.normal(k4, (2, 5, 64), dtype=jnp.float32)   # 5 lane-rows
    obs3 = AvgMinMaxObserver(bit=8, symmetric=False, ch_axis=-1)
    y4 = obs3(x4)
    jax.block_until_ready((y4, obs3.min_val, obs3.max_val))
    assert jnp.allclose(obs3.min_val, jnp.min(x4)), (obs3.min_val, jnp.min(x4))
    assert jnp.allclose(obs3.max_val, jnp.max(x4)), (obs3.max_val, jnp.max(x4))

    scale, zp = obs.calculate_qparams(obs.min_val, obs.max_val)
    s2, zp2 = obs2.calculate_qparams(obs2.min_val, obs2.max_val)
    jax.block_until_ready((scale, zp, s2, zp2))
    assert zp.dtype == jnp.int32

    print("KERNEL_OK")
</pallas_src>

<mosaic_0001>
module attributes {stable_mosaic.version = 11 : i64} {
  func.func @kernel(%arg0: i32, %arg1: memref<16x128xf32, #tpu.memory_space<vmem>>, %arg2: memref<1x8x128xf32, #tpu.memory_space<vmem>>, %arg3: memref<1x8x128xf32, #tpu.memory_space<vmem>>) attributes {dimension_semantics = [#tpu.dimension_semantics<parallel>], iteration_bounds = array<i64: 1>, scalar_prefetch = 0 : i64, scratch_operands = 0 : i64, tpu.core_type = #tpu.core_type<tc>, window_params = [{transform_indices = @transform_0, window_bounds = array<i64: 16, 128>}, {transform_indices = @transform_1, window_bounds = array<i64: 1, 8, 128>}, {transform_indices = @transform_2, window_bounds = array<i64: 1, 8, 128>}]} {
    %c0 = arith.constant 0 : index
    %c0_0 = arith.constant 0 : index
    %0 = vector.load %arg1[%c0, %c0_0] : memref<16x128xf32, #tpu.memory_space<vmem>>, vector<16x128xf32>
    %1 = vector.shape_cast %0 : vector<16x128xf32> to vector<2x8x128xf32>
    %cst = arith.constant dense<0x7F800000> : vector<8x128xf32>
    %2 = vector.multi_reduction <minimumf>, %1, %cst [0] : vector<2x8x128xf32> to vector<8x128xf32>
    %cst_1 = arith.constant dense<0xFF800000> : vector<8x128xf32>
    %3 = vector.multi_reduction <maximumf>, %1, %cst_1 [0] : vector<2x8x128xf32> to vector<8x128xf32>
    %4 = vector.shape_cast %2 : vector<8x128xf32> to vector<1x8x128xf32>
    %c0_2 = arith.constant 0 : index
    %c0_3 = arith.constant 0 : index
    %c0_4 = arith.constant 0 : index
    %5 = vector.load %arg2[%c0_2, %c0_3, %c0_4] : memref<1x8x128xf32, #tpu.memory_space<vmem>>, vector<1x8x128xf32>
    tpu.vector_store %arg2[%c0_2, %c0_3, %c0_4], %4 {strides = array<i32>} : memref<1x8x128xf32, #tpu.memory_space<vmem>>, vector<1x8x128xf32>,
    %6 = vector.shape_cast %3 : vector<8x128xf32> to vector<1x8x128xf32>
    %c0_5 = arith.constant 0 : index
    %c0_6 = arith.constant 0 : index
    %c0_7 = arith.constant 0 : index
    %7 = vector.load %arg3[%c0_5, %c0_6, %c0_7] : memref<1x8x128xf32, #tpu.memory_space<vmem>>, vector<1x8x128xf32>
    tpu.vector_store %arg3[%c0_5, %c0_6, %c0_7], %6 {strides = array<i32>} : memref<1x8x128xf32, #tpu.memory_space<vmem>>, vector<1x8x128xf32>,
    return
  }
  func.func @transform_0(%arg0: i32) -> (i32, i32) {
    %c0_i32 = arith.constant 0 : i32
    %c0_i32_0 = arith.constant 0 : i32
    return %arg0, %c0_i32 : i32, i32
  }
  func.func @transform_1(%arg0: i32) -> (i32, i32, i32) {
    %c0_i32 = arith.constant 0 : i32
    %c0_i32_0 = arith.constant 0 : i32
    %c0_i32_1 = arith.constant 0 : i32
    return %arg0, %c0_i32, %c0_i32_0 : i32, i32, i32
  }
  func.func @transform_2(%arg0: i32) -> (i32, i32, i32) {
    %c0_i32 = arith.constant 0 : i32
    %c0_i32_0 = arith.constant 0 : i32
    %c0_i32_1 = arith.constant 0 : i32
    return %arg0, %c0_i32, %c0_i32_0 : i32, i32, i32
  }
}

</mosaic_0001>

<bundles_post_ra>
// kernel: _observe_update_f32.1
= control target key start
LH: loop header
LB: loop body
LE: loop exit
PB: predicated region body
PF: predicated region fallthrough
CT: control target
= control target key end

     0   :  { %s51_s0 = inlined_call_operand.vmem [shape: f32[16,128], index: 0, kind: input, shape index: {}]   ;;  %s52_s1 = inlined_call_operand.vmem [shape: f32[1,8,128], index: 1, kind: output, shape index: {0}]   ;;  %s53_s2 = inlined_call_operand.vmem [shape: f32[1,8,128], index: 2, kind: output, shape index: {1}]  }
   0x1   :  { %v10_v0 = vld [vmem:[%s51_s0] sm:$0xff]  ;;  %v11_v1 = vld [vmem:[%s51_s0 + $0x8] sm:$0xff] }
   0x2   :  { %v12_v2 = vmin.f32 %v10_v0, %v11_v1  ;;  %v13_v3 = vmax.f32 %v10_v0, %v11_v1 }
   0x4   :  { %14 = vst [vmem:[%s52_s1] sm:$0xff] %v12_v2  ;;  %15 = vst [vmem:[%s53_s2] sm:$0xff] %v13_v3 }

</bundles_post_ra>
